<compile_context>
chip_gen: v7x
topology: tpu7x:2x2x1
jax: 0.10.0
libtpu: 0.0.40
codegen_flags: <defaults>
</compile_context>

<pallas_src>
import functools

import jax
import jax.numpy as jnp
from jax import lax
from jax.experimental import pallas as pl
from jax.experimental.pallas import tpu as pltpu


def _round_up(x, m):
    return ((x + m - 1) // m) * m


def _pick_block_b(B, max_block=1024):
    """Batch tile: as large as possible but leaving >= 2 grid steps (v7x megacore)."""
    b8 = _round_up(max(B, 8), 8)
    half = _round_up((b8 + 1) // 2, 8)
    return max(8, min(max_block, half))


def encoder_kernel(x_ref, w1_ref, b1_ref, w2_ref, b2_ref, wh_ref, bh_ref,
                   out_ref, *, output_dim):
    """One batch tile: two tanh layers + fused (mu | logsigma) head, sigma = exp."""
    x = x_ref[...].astype(w1_ref.dtype)                        # bf16 (block_b, in_dim)
    h1 = jnp.tanh(
        jnp.dot(x, w1_ref[...], preferred_element_type=jnp.float32) + b1_ref[...]
    )                                                          # f32 (block_b, hid_p)
    h2 = jnp.tanh(
        jnp.dot(h1.astype(w2_ref.dtype), w2_ref[...],
                preferred_element_type=jnp.float32) + b2_ref[...]
    )                                                          # f32 (block_b, hid_p)
    head = (
        jnp.dot(h2.astype(wh_ref.dtype), wh_ref[...],
                preferred_element_type=jnp.float32) + bh_ref[...]
    )                                                          # f32 (block_b, 2*out)
    # Head lane layout: [ mu (output_dim) | logsigma (output_dim) ].
    # Apply exp only on the logsigma columns.  NOTE: jnp.exp is also evaluated on
    # the mu columns before the select; any inf produced there is discarded by
    # jnp.where (benign select, not arithmetic) -- do not refactor into a
    # mask-multiply or it becomes NaN.
    col = lax.broadcasted_iota(jnp.int32, head.shape, 1)
    head = jnp.where(col >= output_dim, jnp.exp(head), head)
    out_ref[...] = head.astype(out_ref.dtype)


def prepare_params(params):
    """One-time layout prep: pad hidden dim to 128 lanes, fuse mu/logsigma head,
    cast MXU operands to bf16.  Weights are (in_features, out_features)."""
    input_dim = params["w1"].shape[0]
    hidden_dim = params["w1"].shape[1]
    output_dim = params["wmu"].shape[1]
    hid_p = _round_up(hidden_dim, 128)
    head_w = 2 * output_dim

    f32, bf16 = jnp.float32, jnp.bfloat16

    def pad2(a, r, c):
        return jnp.pad(a, ((0, r - a.shape[0]), (0, c - a.shape[1])))

    prep = dict(
        w1=pad2(params["w1"], input_dim, hid_p).astype(bf16),           # (in, hid_p)
        b1=pad2(params["b1"].astype(f32), 1, hid_p),                    # (1, hid_p)
        w2=pad2(params["w2"], hid_p, hid_p).astype(bf16),               # (hid_p, hid_p)
        b2=pad2(params["b2"].astype(f32), 1, hid_p),                    # (1, hid_p)
        wh=pad2(jnp.concatenate([params["wmu"], params["wls"]], axis=1),
                hid_p, head_w).astype(bf16),                            # (hid_p, 2*out)
        bh=pad2(jnp.concatenate([params["bmu"], params["bls"]], axis=1).astype(f32),
                1, head_w),                                             # (1, 2*out)
    )
    return prep, output_dim


@functools.partial(jax.jit, static_argnames=("block_b", "output_dim"))
def _encoder_forward_impl(x, w1, b1, w2, b2, wh, bh, *, block_b, output_dim):
    B, input_dim = x.shape
    hid_p = w1.shape[1]
    head_w = wh.shape[1]                       # == 2 * output_dim
    b_p = _round_up(B, block_b)
    grid = (b_p // block_b,)

    x_p = x if b_p == B else jnp.pad(x, ((0, b_p - B), (0, 0)))   # batch pad only

    x_spec = pl.BlockSpec((block_b, input_dim), lambda i: (i, 0))
    full2d = lambda r, c: pl.BlockSpec((r, c), lambda i: (0, 0))   # constant block
    out_spec = pl.BlockSpec((block_b, head_w), lambda i: (i, 0))

    # Advisory cost estimate.
    flops = 2 * b_p * (input_dim * hid_p + hid_p * hid_p + hid_p * head_w)
    transcendentals = b_p * (2 * hid_p + head_w)           # tanh x2 layers + exp head
    bytes_accessed = (x_p.size * 4 + (w1.size + w2.size + wh.size) * 2
                      + (b1.size + b2.size + bh.size) * 4 + b_p * head_w * 4)
    cost = pl.CostEstimate(flops=flops, transcendentals=transcendentals,
                           bytes_accessed=bytes_accessed)

    fused = pl.pallas_call(
        functools.partial(encoder_kernel, output_dim=output_dim),
        out_shape=jax.ShapeDtypeStruct((b_p, head_w), jnp.float32),
        grid_spec=pltpu.PrefetchScalarGridSpec(
            num_scalar_prefetch=0,
            grid=grid,
            in_specs=[
                x_spec,
                full2d(input_dim, hid_p),   # w1
                full2d(1, hid_p),           # b1
                full2d(hid_p, hid_p),       # w2
                full2d(1, hid_p),           # b2
                full2d(hid_p, head_w),      # [wmu | wls] fused head weight
                full2d(1, head_w),          # [bmu | bls] fused head bias
            ],
            out_specs=out_spec,
        ),
        compiler_params=pltpu.CompilerParams(
            dimension_semantics=("parallel",),
        ),
        cost_estimate=cost,
    )(x_p, w1, b1, w2, b2, wh, bh)

    res = fused[:B]                            # single narrow slice, then split
    mu = res[:, :output_dim]
    sigma = res[:, output_dim:]
    return mu, sigma


def encoder_forward(x, prep, output_dim):
    """x: (B, input_dim) f32.  prep: output of prepare_params (padded bf16/f32)."""
    block_b = _pick_block_b(x.shape[0])
    return _encoder_forward_impl(
        x, prep["w1"], prep["b1"], prep["w2"], prep["b2"], prep["wh"], prep["bh"],
        block_b=block_b, output_dim=output_dim)


def init_params(key, input_dim, hidden_dim, output_dim):
    """Deterministic init mimicking nn.Linear's uniform(-1/sqrt(fan_in), 1/sqrt(fan_in)).

    Weights are stored transposed w.r.t. PyTorch: (in_features, out_features)."""
    ks = jax.random.split(key, 8)

    def linear(kw, kb, fan_in, fan_out):
        bound = 1.0 / jnp.sqrt(fan_in)
        w = jax.random.uniform(kw, (fan_in, fan_out), jnp.float32, -bound, bound)
        b = jax.random.uniform(kb, (1, fan_out), jnp.float32, -bound, bound)
        return w, b

    w1, b1 = linear(ks[0], ks[1], input_dim, hidden_dim)
    w2, b2 = linear(ks[2], ks[3], hidden_dim, hidden_dim)
    wmu, bmu = linear(ks[4], ks[5], hidden_dim, output_dim)
    wls, bls = linear(ks[6], ks[7], hidden_dim, output_dim)
    return dict(w1=w1, b1=b1, w2=w2, b2=b2, wmu=wmu, bmu=bmu, wls=wls, bls=bls)


def encoder_reference(x, p, matmul_dtype=jnp.float32):
    """Pure-JAX reference; matmul_dtype=bfloat16 emulates the kernel's MXU numerics."""
    def mm(a, w):
        return jnp.dot(a.astype(matmul_dtype), w.astype(matmul_dtype),
                       preferred_element_type=jnp.float32)
    h = jnp.tanh(mm(x, p["w1"]) + p["b1"])
    h = jnp.tanh(mm(h, p["w2"]) + p["b2"])
    mu = mm(h, p["wmu"]) + p["bmu"]
    sigma = jnp.exp(mm(h, p["wls"]) + p["bls"])
    return mu, sigma


if __name__ == "__main__":
    key = jax.random.PRNGKey(0)
    k_x, k_p = jax.random.split(key)

    # Small shapes consistent with Encoder(input_dim, hidden_dim=200, output_dim)
    batch, input_dim, hidden_dim, output_dim = 64, 16, 200, 8

    x = jax.random.normal(k_x, (batch, input_dim), dtype=jnp.float32)
    params = init_params(k_p, input_dim, hidden_dim, output_dim)

    # One-time layout prep (hoisted out of the per-call path).
    prep, out_dim = prepare_params(params)
    jax.block_until_ready(prep)

    mu, sigma = encoder_forward(x, prep, out_dim)
    jax.block_until_ready((mu, sigma))

    # Tight check against a reference emulating the kernel's bf16-MXU / f32-acc numerics.
    mu_bf, sigma_bf = encoder_reference(x, params, matmul_dtype=jnp.bfloat16)
    assert jnp.allclose(mu, mu_bf, atol=2e-3, rtol=2e-3)
    assert jnp.allclose(sigma, sigma_bf, atol=2e-3, rtol=2e-3)

    # Looser check against the exact f32 PyTorch-equivalent math (bf16 rounding only).
    mu_f32, sigma_f32 = encoder_reference(x, params)
    assert jnp.allclose(mu, mu_f32, atol=5e-2, rtol=5e-2)
    assert jnp.allclose(sigma, sigma_f32, atol=5e-2, rtol=5e-2)

    print("KERNEL_OK")
</pallas_src>

<mosaic_0001>
module attributes {stable_mosaic.version = 11 : i64} {
  func.func @encoder_kernel(%arg0: i32, %arg1: memref<32x16xf32, #tpu.memory_space<vmem>>, %arg2: memref<16x256xbf16, #tpu.memory_space<vmem>>, %arg3: memref<1x256xf32, #tpu.memory_space<vmem>>, %arg4: memref<256x256xbf16, #tpu.memory_space<vmem>>, %arg5: memref<1x256xf32, #tpu.memory_space<vmem>>, %arg6: memref<256x16xbf16, #tpu.memory_space<vmem>>, %arg7: memref<1x16xf32, #tpu.memory_space<vmem>>, %arg8: memref<32x16xf32, #tpu.memory_space<vmem>>) attributes {dimension_semantics = [#tpu.dimension_semantics<parallel>], iteration_bounds = array<i64: 2>, scalar_prefetch = 0 : i64, scratch_operands = 0 : i64, tpu.core_type = #tpu.core_type<tc>, window_params = [{transform_indices = @transform_0, window_bounds = array<i64: 32, 16>}, {pipeline_mode = #tpu.pipeline_mode<synchronous>, transform_indices = @transform_1, window_bounds = array<i64: 16, 256>}, {pipeline_mode = #tpu.pipeline_mode<synchronous>, transform_indices = @transform_2, window_bounds = array<i64: 1, 256>}, {pipeline_mode = #tpu.pipeline_mode<synchronous>, transform_indices = @transform_3, window_bounds = array<i64: 256, 256>}, {pipeline_mode = #tpu.pipeline_mode<synchronous>, transform_indices = @transform_4, window_bounds = array<i64: 1, 256>}, {pipeline_mode = #tpu.pipeline_mode<synchronous>, transform_indices = @transform_5, window_bounds = array<i64: 256, 16>}, {pipeline_mode = #tpu.pipeline_mode<synchronous>, transform_indices = @transform_6, window_bounds = array<i64: 1, 16>}, {transform_indices = @transform_7, window_bounds = array<i64: 32, 16>}]} {
    %c0 = arith.constant 0 : index
    %c0_0 = arith.constant 0 : index
    %0 = vector.load %arg1[%c0, %c0_0] : memref<32x16xf32, #tpu.memory_space<vmem>>, vector<32x16xf32>
    %1 = arith.truncf %0 : vector<32x16xf32> to vector<32x16xbf16>
    %c0_1 = arith.constant 0 : index
    %c0_2 = arith.constant 0 : index
    %2 = vector.load %arg2[%c0_1, %c0_2] : memref<16x256xbf16, #tpu.memory_space<vmem>>, vector<16x256xbf16>
    %cst = arith.constant dense<0.000000e+00> : vector<32x256xf32>
    %3 = tpu.matmul %1, %2, %cst {dimension_numbers = #tpu.dot_dimension_numbers<[1], [0], [0], [1], [0, 0, 1, 1], [], []>} : vector<32x16xbf16>, vector<16x256xbf16>, vector<32x256xf32> -> vector<32x256xf32>
    %c0_3 = arith.constant 0 : index
    %c0_4 = arith.constant 0 : index
    %4 = vector.load %arg3[%c0_3, %c0_4] : memref<1x256xf32, #tpu.memory_space<vmem>>, vector<1x256xf32>
    %5 = vector.broadcast %4 : vector<1x256xf32> to vector<32x256xf32>
    %6 = arith.addf %3, %5 : vector<32x256xf32>
    %7 = math.tanh %6 : vector<32x256xf32>
    %8 = arith.truncf %7 : vector<32x256xf32> to vector<32x256xbf16>
    %c0_5 = arith.constant 0 : index
    %c0_6 = arith.constant 0 : index
    %9 = vector.load %arg4[%c0_5, %c0_6] : memref<256x256xbf16, #tpu.memory_space<vmem>>, vector<256x256xbf16>
    %cst_7 = arith.constant dense<0.000000e+00> : vector<32x256xf32>
    %10 = tpu.matmul %8, %9, %cst_7 {dimension_numbers = #tpu.dot_dimension_numbers<[1], [0], [0], [1], [0, 0, 1, 1], [], []>} : vector<32x256xbf16>, vector<256x256xbf16>, vector<32x256xf32> -> vector<32x256xf32>
    %c0_8 = arith.constant 0 : index
    %c0_9 = arith.constant 0 : index
    %11 = vector.load %arg5[%c0_8, %c0_9] : memref<1x256xf32, #tpu.memory_space<vmem>>, vector<1x256xf32>
    %12 = vector.broadcast %11 : vector<1x256xf32> to vector<32x256xf32>
    %13 = arith.addf %10, %12 : vector<32x256xf32>
    %14 = math.tanh %13 : vector<32x256xf32>
    %15 = arith.truncf %14 : vector<32x256xf32> to vector<32x256xbf16>
    %c0_10 = arith.constant 0 : index
    %c0_11 = arith.constant 0 : index
    %16 = vector.load %arg6[%c0_10, %c0_11] : memref<256x16xbf16, #tpu.memory_space<vmem>>, vector<256x16xbf16>
    %cst_12 = arith.constant dense<0.000000e+00> : vector<32x16xf32>
    %17 = tpu.matmul %15, %16, %cst_12 {dimension_numbers = #tpu.dot_dimension_numbers<[1], [0], [0], [1], [0, 0, 1, 1], [], []>} : vector<32x256xbf16>, vector<256x16xbf16>, vector<32x16xf32> -> vector<32x16xf32>
    %c0_13 = arith.constant 0 : index
    %c0_14 = arith.constant 0 : index
    %18 = vector.load %arg7[%c0_13, %c0_14] : memref<1x16xf32, #tpu.memory_space<vmem>>, vector<1x16xf32>
    %19 = vector.broadcast %18 : vector<1x16xf32> to vector<32x16xf32>
    %20 = arith.addf %17, %19 : vector<32x16xf32>
    %21 = tpu.iota {dimensions = array<i32: 1>} : vector<32x16xi32>
    %c8_i32 = arith.constant 8 : i32
    %22 = vector.broadcast %c8_i32 : i32 to vector<32x16xi32>
    %23 = arith.cmpi sge, %21, %22 : vector<32x16xi32>
    %24 = math.exp %20 : vector<32x16xf32>
    %25 = arith.select %23, %24, %20 : vector<32x16xi1>, vector<32x16xf32>
    %c0_15 = arith.constant 0 : index
    %c0_16 = arith.constant 0 : index
    %26 = vector.load %arg8[%c0_15, %c0_16] : memref<32x16xf32, #tpu.memory_space<vmem>>, vector<32x16xf32>
    tpu.vector_store %arg8[%c0_15, %c0_16], %25 {strides = array<i32>} : memref<32x16xf32, #tpu.memory_space<vmem>>, vector<32x16xf32>,
    return
  }
  func.func @transform_0(%arg0: i32) -> (i32, i32) {
    %c0_i32 = arith.constant 0 : i32
    %c0_i32_0 = arith.constant 0 : i32
    return %arg0, %c0_i32 : i32, i32
  }
  func.func @transform_1(%arg0: i32) -> (i32, i32) {
    %c0_i32 = arith.constant 0 : i32
    %c0_i32_0 = arith.constant 0 : i32
    %c0_i32_1 = arith.constant 0 : i32
    return %c0_i32, %c0_i32_0 : i32, i32
  }
  func.func @transform_2(%arg0: i32) -> (i32, i32) {
    %c0_i32 = arith.constant 0 : i32
    %c0_i32_0 = arith.constant 0 : i32
    %c0_i32_1 = arith.constant 0 : i32
    return %c0_i32, %c0_i32_0 : i32, i32
  }
  func.func @transform_3(%arg0: i32) -> (i32, i32) {
    %c0_i32 = arith.constant 0 : i32
    %c0_i32_0 = arith.constant 0 : i32
    %c0_i32_1 = arith.constant 0 : i32
    return %c0_i32, %c0_i32_0 : i32, i32
  }
  func.func @transform_4(%arg0: i32) -> (i32, i32) {
    %c0_i32 = arith.constant 0 : i32
    %c0_i32_0 = arith.constant 0 : i32
    %c0_i32_1 = arith.constant 0 : i32
    return %c0_i32, %c0_i32_0 : i32, i32
  }
  func.func @transform_5(%arg0: i32) -> (i32, i32) {
    %c0_i32 = arith.constant 0 : i32
    %c0_i32_0 = arith.constant 0 : i32
    %c0_i32_1 = arith.constant 0 : i32
    return %c0_i32, %c0_i32_0 : i32, i32
  }
  func.func @transform_6(%arg0: i32) -> (i32, i32) {
    %c0_i32 = arith.constant 0 : i32
    %c0_i32_0 = arith.constant 0 : i32
    %c0_i32_1 = arith.constant 0 : i32
    return %c0_i32, %c0_i32_0 : i32, i32
  }
  func.func @transform_7(%arg0: i32) -> (i32, i32) {
    %c0_i32 = arith.constant 0 : i32
    %c0_i32_0 = arith.constant 0 : i32
    return %arg0, %c0_i32 : i32, i32
  }
}

</mosaic_0001>

<bundles_post_ra>
// kernel: _encoder_forward_impl.1
= control target key start
LH: loop header
LB: loop body
LE: loop exit
PB: predicated region body
PF: predicated region fallthrough
CT: control target
= control target key end

     0   :  { %12 = vsyncpa [#allocation3], 0  ;;  %s1247_s24 = smov 0   ;;  %s1396_s0 = inlined_call_operand.vmem [shape: f32[64,16], index: 0, kind: input, shape index: {}]   ;;  %s1397_s1 = inlined_call_operand.vmem [shape: bf16[16,256], index: 1, kind: input, shape index: {}]   ;;  %s1398_s2 = inlined_call_operand.vmem [shape: f32[1,256], index: 2, kind: input, shape index: {}]   ;;  %s1399_s3 = inlined_call_operand.hbm [shape: bf16[256,256], index: 3, kind: input, shape index: {}]   ;;  %s1400_s4 = inlined_call_operand.vmem [shape: f32[1,256], index: 4, kind: input, shape index: {}]   ;;  %s1401_s5 = inlined_call_operand.vmem [shape: bf16[256,16], index: 5, kind: input, shape index: {}]   ;;  %s1402_s6 = inlined_call_operand.vmem [shape: f32[1,16], index: 6, kind: input, shape index: {}]   ;;  %s1403_s7 = inlined_call_operand.vmem [shape: f32[64,16], index: 7, kind: output, shape index: {}]  }
   0x1 LB: > { %s940_s25 = sadd.s32 4294967295, %s1201_s24   ;;  %p942_p0 = scmp.ge.s32.totalorder %s1201_s24, 1  ;;  %s1201_s24 = sphi %s1247_s24, %s18_s24  }
   0x2   : > { %p201_p1 = scmp.lt.s32.totalorder %s1201_s24, 3  ;;  %s1203_s26 = smov [#allocation2]  }
   0x3   : > { %s219_s27 = sshll.u32 %s1203_s26, 4  ;;  %p1261_p3 = scmp.eq.s32.totalorder %s940_s25, 0  ;;  %s220_s27 = int_to_ptr.vmem [resolvable:$true] %s219_s27 }
   0x4   : > { %p1255_p2 = pnand %p942_p0, %p201_p1  ;;  %s1163_s10 = scalar_lea.hbm %s1399_s3, 4096 }
   0x5   : > { %s1408_s29 = scalar_select %p1261_p3, 1, 0 }
   0x6   : > { %s1407_s28 = scalar_select %p1255_p2, 1, 0 }
   0x7   : > { %p1038_p4 = pneg %p1255_p2  ;;  %p1164_p6 = scmp.ne.s32.totalorder %s1399_s3, %s1163_s10 }
   0x8   : > { %p1170_p10 = scmp.lt.u32.totalorder %s1163_s10, %s1399_s3 }
   0x9   : > { %p1269_p5 = pnand %p1261_p3, %p1038_p4 }
   0xb   : > { %p1165_p7 = pneg %p1269_p5 }
   0xd   : > { %p1166_p8 = pnand %p1165_p7, %p1164_p6 }
   0xf   : > { %p1167_p9 = pneg %p1166_p8 }
  0x11   : > { %p1172_p11 = pnand %p1170_p10, %p1167_p9 }
  0x13   : > { %1175 = shalt.err (!%p1172_p11)
}
  0x14   : > { %s1176_s15 = scalar_lea.vmem %s220_s27, 4096  ;;  %p1184_p1 = scmp.lt.s32.totalorder %s220_s27, %s220_s27 }
  0x15   : > { %p1177_p12 = scmp.ne.s32.totalorder %s220_s27, %s1176_s15  ;;  %p1185_p4 = scmp.lt.s32.totalorder %s1176_s15, %s1176_s15 }
  0x17   : > { %p1179_p13 = pnand %p1177_p12, %p1165_p7  ;;  %p1186_p3 = por %p1185_p4, %p1184_p1 }
  0x19   : > { %p1180_p0 = pneg %p1179_p13 }
  0x1b   : > { %p1187_p2 = pnand %p1186_p3, %p1180_p0 }
  0x1d   : > { %1190 = shalt.err (!%p1187_p2)
}
  0x1e   : > { %s1204_s16 = smov 128   ;;  %s1205_s17 = smov 8  }
  0x1f   : > { %1041 = dma.hbm_to_vmem [thread:$0]  (!%p1269_p5), %s1399_s3, 4096, %s220_s27, [#allocation3], %s1204_s16, %s1204_s16, %s1205_s17  }
  0x20   : > { %p1410_p6 = scmp.ne.s32.totalorder %s1407_s28, 0 }
  0x21   : > { %p1411_p8 = scmp.ne.s32.totalorder (!%p1410_p6), %s1408_s29, 0 }
  0x22   : > { %253 = sbr.rel (%p1410_p6) target bundleno = 755 (0x2f3), region = 48 }
  0x29   : > { %1196 = dma.done.wait (%p1411_p8), [#allocation3], 4096  }
  0x2a   : > { %1198 = vsyncadd (%p1411_p8), [#allocation3], 4294963200  ;;  %s947_s20 = sshll.u32 %s940_s25, 2  ;;  %v1206_v0 = vmov 0   ;;  %v1056_v1 = vld [vmem:[%s1397_s1 + $0x4] ss:$8 sps:$4 sm:$0xff]   ;;  %v308_v47 = vlaneseq }
  0x2b   : > { %367 = vmatprep.mubr.bf16.mxu0 %v1206_v0  ;;  %p286_p2 = scmp.lt.s32.totalorder %s947_s20, 7  ;;  %v1058_v2 = vld [vmem:[%s1397_s1] ss:$8 sps:$4 sm:$0xff]   ;;  %335 = vmatprep.subr.bf16.mxu0 %v1056_v1  ;;  %vm328_vm0 = vcmask 130048   ;;  %v1059_v6 = vld [vmem:[#allocation2 + $0x4] ss:$8 sps:$4 sm:$0xff]  }
  0x2c   : > { %336 = vmatpush1.bf16.msra.mxu0 %v1058_v2  ;;  %v1061_v7 = vld [vmem:[#allocation2] ss:$8 sps:$4 sm:$0xff]   ;;  %v1062_v8 = vld [vmem:[#allocation2 + $0x14] ss:$8 sps:$4 sm:$0xff]   ;;  %604 = vmatprep.subr.bf16.mxu1 %v1059_v6  ;;  %v1064_v10 = vld [vmem:[#allocation2 + $0x10] ss:$8 sps:$4 sm:$0xff]  }
  0x2d   : > { %s1413_s20 = smov (!%p286_p2, %s947_s20), 7  ;;  %605 = vmatpush1.bf16.msra.mxu1 %v1061_v7  ;;  %v1065_v12 = vld [vmem:[#allocation2 + $0x24] ss:$8 sps:$4 sm:$0xff]   ;;  %v1067_v14 = vld [vmem:[#allocation2 + $0x20] ss:$8 sps:$4 sm:$0xff]   ;;  %v1111_v45 = vld [vmem:[%s1401_s5 + $0x50] sm:$0xff]  }
  0x2e   : > { %s948_s21 = sshll.u32 %s1413_s20, 3  ;;  %606 = vmatprep.subr.bf16.mxu1 %v1062_v8  ;;  %v1068_v15 = vld [vmem:[#allocation2 + $0x34] ss:$8 sps:$4 sm:$0xff]   ;;  %v1070_v16 = vld [vmem:[#allocation2 + $0x30] ss:$8 sps:$4 sm:$0xff]   ;;  %v1107_v41 = vld [vmem:[%s1401_s5 + $0x40] sm:$0xff]  }
  0x2f   : > { %s289_s26 = scalar_lea.vmem %s1396_s0, %s948_s21  ;;  %v1071_v17 = vld [vmem:[#allocation2 + $0x44] ss:$8 sps:$4 sm:$0xff]   ;;  %v1073_v18 = vld [vmem:[#allocation2 + $0x40] ss:$8 sps:$4 sm:$0xff]   ;;  %v1074_v19 = vld [vmem:[#allocation2 + $0x54] ss:$8 sps:$4 sm:$0xff]   ;;  %1006 = vmatprep.subr.bf16.mxu0 %v1107_v41  ;;  %s295_s25 = scalar_lea.vmem %s1403_s7, %s948_s21 }
  0x30   : > { %v298_v3 = vld [vmem:[%s289_s26] sm:$0xff]  ;;  %v299_v4 = vld [vmem:[%s289_s26 + $0x8] sm:$0xff]  ;;  %v300_v9 = vld [vmem:[%s289_s26 + $0x10] sm:$0xff]  ;;  %v1332_v48 = vshrl.u32 %v308_v47, 7 }
  0x31   : > { %v302_v5 = vpack.c.bf16 %v299_v4, %v298_v3  ;;  %v301_v11 = vld [vmem:[%s289_s26 + $0x18] sm:$0xff]  ;;  %607 = vmatpush1.bf16.msra.mxu1 %v1064_v10  ;;  %v1077_v21 = vld [vmem:[#allocation2 + $0x64] ss:$8 sps:$4 sm:$0xff]   ;;  %v1079_v22 = vld [vmem:[#allocation2 + $0x60] ss:$8 sps:$4 sm:$0xff]  }
  0x32   : > { %v303_v13 = vpack.c.bf16 %v301_v11, %v300_v9  ;;  %608 = vmatprep.subr.bf16.mxu1 %v1065_v12  ;;  %v1076_v20 = vld [vmem:[#allocation2 + $0x50] ss:$8 sps:$4 sm:$0xff]   ;;  %v1080_v23 = vld [vmem:[#allocation2 + $0x74] ss:$8 sps:$4 sm:$0xff]   ;;  %v1083_v25 = vld [vmem:[#allocation2 + $0x84] ss:$8 sps:$4 sm:$0xff]  }
  0x33   : > { %953 = vmatmul.mubr.msk.bf16.vlgmr.msra.gmra.mrb[0].mxu0 %vm328_vm0, %v302_v5  ;;  %v1082_v24 = vld [vmem:[#allocation2 + $0x70] ss:$8 sps:$4 sm:$0xff]   ;;  %v1085_v26 = vld [vmem:[#allocation2 + $0x80] ss:$8 sps:$4 sm:$0xff]   ;;  %v1086_v27 = vld [vmem:[#allocation2 + $0x94] ss:$8 sps:$4 sm:$0xff]  }
  0x34   : > { %377 = vmatprep.mubr.bf16.mxu0 %v1206_v0  ;;  %v1088_v28 = vld [vmem:[#allocation2 + $0x90] ss:$8 sps:$4 sm:$0xff]   ;;  %v1089_v29 = vld [vmem:[#allocation2 + $0xa4] ss:$8 sps:$4 sm:$0xff]   ;;  %v1091_v30 = vld [vmem:[#allocation2 + $0xa0] ss:$8 sps:$4 sm:$0xff]  }
  0x35   : > { %609 = vmatpush1.bf16.msra.mxu1 %v1067_v14  ;;  %v1092_v31 = vld [vmem:[#allocation2 + $0xb4] ss:$8 sps:$4 sm:$0xff]   ;;  %v1094_v32 = vld [vmem:[#allocation2 + $0xb0] ss:$8 sps:$4 sm:$0xff]   ;;  %v1095_v33 = vld [vmem:[#allocation2 + $0xc4] ss:$8 sps:$4 sm:$0xff]  }
  0x36   : > { %610 = vmatprep.subr.bf16.mxu1 %v1068_v15  ;;  %v1097_v34 = vld [vmem:[#allocation2 + $0xc0] ss:$8 sps:$4 sm:$0xff]   ;;  %v1098_v35 = vld [vmem:[#allocation2 + $0xd4] ss:$8 sps:$4 sm:$0xff]   ;;  %v1100_v36 = vld [vmem:[#allocation2 + $0xd0] ss:$8 sps:$4 sm:$0xff]  }
  0x37   : > { %v1101_v37 = vld [vmem:[#allocation2 + $0xe4] ss:$8 sps:$4 sm:$0xff]   ;;  %v1103_v38 = vld [vmem:[#allocation2 + $0xe0] ss:$8 sps:$4 sm:$0xff]   ;;  %v1104_v39 = vld [vmem:[#allocation2 + $0xf4] ss:$8 sps:$4 sm:$0xff]  }
  0x38   : > { %v1106_v40 = vld [vmem:[#allocation2 + $0xf0] ss:$8 sps:$4 sm:$0xff]   ;;  %v1108_v42 = vld [vmem:[%s1401_s5] sm:$0xff]   ;;  %v1109_v43 = vld [vmem:[%s1401_s5 + $0x48] sm:$0xff]   ;;  %v310_v49 = vsub.s32 0, %v1332_v48  ;;  %v314_v51 = vsub.s32 1, %v1332_v48 }
  0x39   : > { %611 = vmatpush1.bf16.msra.mxu1 %v1070_v16  ;;  %1007 = vmatpush3.bf16.msra.mxu0 %v1108_v42  ;;  %v1110_v44 = vld [vmem:[%s1401_s5 + $0x8] sm:$0xff]   ;;  %v1112_v46 = vld [vmem:[%s1401_s5 + $0x10] sm:$0xff]   ;;  %v306_v50 = vld [vmem:[%s1398_s2] sm:$0x3] }
  0x3a   : > { %612 = vmatprep.subr.bf16.mxu1 %v1071_v17  ;;  %1008 = vmatprep.subr.bf16.mxu0 %v1109_v43  ;;  %v311_v52 = vrot.slane %v306_v50, %v310_v49  ;;  %v315_v53 = vrot.slane %v306_v50, %v314_v51 }
  0x3b   : > { %954 = vmatmul.mubr.msk.bf16.gmra.mrb[4].mxu0 %vm328_vm0, %v303_v13 }
  0x3d   : > { %613 = vmatpush1.bf16.msra.mxu1 %v1073_v18  ;;  %1009 = vmatpush3.bf16.msra.mxu0 %v1110_v44  ;;  %v1113_v18 = vld [vmem:[%s1401_s5 + $0x58] sm:$0xff]  }
  0x3e   : > { %614 = vmatprep.subr.bf16.mxu1 %v1074_v19  ;;  %1010 = vmatprep.subr.bf16.mxu0 %v1111_v45  ;;  %v1114_v19 = vld [vmem:[%s1401_s5 + $0x18] sm:$0xff]  }
  0x41   : > { %615 = vmatpush1.bf16.msra.mxu1 %v1076_v20  ;;  %1011 = vmatpush3.bf16.msra.mxu0 %v1112_v46  ;;  %v1115_v20 = vld [vmem:[%s1401_s5 + $0x60] sm:$0xff]  }
  0x42   : > { %616 = vmatprep.subr.bf16.mxu1 %v1077_v21  ;;  %1012 = vmatprep.subr.bf16.mxu0 %v1113_v18  ;;  %v1116_v21 = vld [vmem:[%s1401_s5 + $0x20] sm:$0xff]  }
  0x45   : > { %617 = vmatpush1.bf16.msra.mxu1 %v1079_v22  ;;  %1013 = vmatpush3.bf16.msra.mxu0 %v1114_v19  ;;  %v1117_v22 = vld [vmem:[%s1401_s5 + $0x68] sm:$0xff]  }
  0x46   : > { %618 = vmatprep.subr.bf16.mxu1 %v1080_v23  ;;  %1014 = vmatprep.subr.bf16.mxu0 %v1115_v20  ;;  %v1118_v23 = vld [vmem:[%s1401_s5 + $0x28] sm:$0xff]  }
  0x49   : > { %619 = vmatpush1.bf16.msra.mxu1 %v1082_v24  ;;  %1015 = vmatpush3.bf16.msra.mxu0 %v1116_v21  ;;  %v1119_v24 = vld [vmem:[%s1401_s5 + $0x70] sm:$0xff]  }
  0x4a   : > { %620 = vmatprep.subr.bf16.mxu1 %v1083_v25  ;;  %1016 = vmatprep.subr.bf16.mxu0 %v1117_v22  ;;  %v1120_v25 = vld [vmem:[%s1401_s5 + $0x30] sm:$0xff]  }
  0x4d   : > { %621 = vmatpush1.bf16.msra.mxu1 %v1085_v26  ;;  %1017 = vmatpush3.bf16.msra.mxu0 %v1118_v23  ;;  %v1121_v26 = vld [vmem:[%s1401_s5 + $0x78] sm:$0xff]  }
  0x4e   : > { %622 = vmatprep.subr.bf16.mxu1 %v1086_v27  ;;  %1018 = vmatprep.subr.bf16.mxu0 %v1119_v24  ;;  %v1122_v27 = vld [vmem:[%s1401_s5 + $0x38] sm:$0xff]  }
  0x51   : > { %623 = vmatpush1.bf16.msra.mxu1 %v1088_v28  ;;  %1019 = vmatpush3.bf16.msra.mxu0 %v1120_v25  ;;  %v432_v28 = vld [vmem:[%s1400_s4] sm:$0x3] }
  0x52   : > { %624 = vmatprep.subr.bf16.mxu1 %v1089_v29  ;;  %1020 = vmatprep.subr.bf16.mxu0 %v1121_v26  ;;  %v437_v29 = vrot.slane %v432_v28, %v310_v49 }
  0x55   : > { %625 = vmatpush1.bf16.msra.mxu1 %v1091_v30  ;;  %1021 = vmatpush3.bf16.msra.mxu0 %v1122_v27  ;;  %v441_v30 = vrot.slane %v432_v28, %v314_v51 }
  0x56   : > { %626 = vmatprep.subr.bf16.mxu1 %v1092_v31 }
  0x59   : > { %627 = vmatpush1.bf16.msra.mxu1 %v1094_v32 }
  0x5a   : > { %628 = vmatprep.subr.bf16.mxu1 %v1095_v33 }
  0x5d   : > { %629 = vmatpush1.bf16.msra.mxu1 %v1097_v34 }
  0x5e   : > { %630 = vmatprep.subr.bf16.mxu1 %v1098_v35 }
  0x61   : > { %631 = vmatpush1.bf16.msra.mxu1 %v1100_v36 }
  0x62   : > { %632 = vmatprep.subr.bf16.mxu1 %v1101_v37 }
  0x65   : > { %633 = vmatpush1.bf16.msra.mxu1 %v1103_v38 }
  0x66   : > { %634 = vmatprep.subr.bf16.mxu1 %v1104_v39 }
  0x69   : > { %635 = vmatpush1.bf16.msra.mxu1 %v1106_v40 }
 0x106   : > { %v369_v54 = vpop.f32.mrb[0].mxu0 }
 0x107   : > { %v370_v55 = vadd.f32 %v369_v54, %v311_v52  ;;  %v371_v56 = vpop.f32.mrb[1].mxu0 }
 0x108   : > { %v372_v57 = vadd.f32 %v371_v56, %v315_v53  ;;  %v373_v58 = vpop.f32.mrb[2].mxu0 }
 0x109   : > { %1123 = vtanh.f32 %v370_v55  ;;  %v374_v59 = vadd.f32 %v373_v58, %v311_v52  ;;  %v375_v60 = vpop.f32.mrb[3].mxu0 }
 0x10a   : > { %1125 = vtanh.f32 %v372_v57  ;;  %v376_v61 = vadd.f32 %v375_v60, %v315_v53 }
 0x10b   : > { %1127 = vtanh.f32 %v374_v59 }
 0x10c   : > { %1129 = vtanh.f32 %v376_v61  ;;  %v987_v61 = vld [vmem:[%s1402_s6] ss:$0 sm:$0xff] }
 0x10e   : > { %v379_v62 = vpop.f32.mrb[4].mxu0 }
 0x10f   : > { %v380_v63 = vadd.f32 %v379_v62, %v311_v52  ;;  %v381_v0 = vpop.f32.mrb[5].mxu0 }
 0x110   : > { %v382_v1 = vadd.f32 %v381_v0, %v315_v53  ;;  %v383_v2 = vpop.f32.mrb[6].mxu0 }
 0x111   : > { %1131 = vtanh.f32 %v380_v63  ;;  %v384_v3 = vadd.f32 %v383_v2, %v311_v52  ;;  %v385_v4 = vpop.f32.mrb[7].mxu0 }
 0x112   : > { %1133 = vtanh.f32 %v382_v1  ;;  %v386_v5 = vadd.f32 %v385_v4, %v315_v53 }
 0x113   : > { %v1124_v6 = vpop.eup %1123  ;;  %1135 = vtanh.f32 %v384_v3 }
 0x114   : > { %v1126_v7 = vpop.eup %1125  ;;  %1137 = vtanh.f32 %v386_v5 }
 0x115   : > { %v1128_v8 = vpop.eup %1127 }
 0x116   : > { %v1130_v9 = vpop.eup %1129  ;;  %v396_v10 = vpack.c.bf16 %v1128_v8, %v1124_v6 }
 0x117   : > { %v397_v11 = vpack.c.bf16 %v1130_v9, %v1126_v7 }
 0x119   : > { %636 = vmatprep.mubr.bf16.mxu1 %v397_v11 }
 0x11a   : > { %637 = vmatmul.mubr.bf16.vlgmr.msra.gmra.mrb[0].mxu1 %v396_v10 }
 0x11b   : > { %v1132_v12 = vpop.eup %1131 }
 0x11c   : > { %v1134_v13 = vpop.eup %1133 }
 0x11d   : > { %v1136_v14 = vpop.eup %1135 }
 0x11e   : > { %v1138_v15 = vpop.eup %1137  ;;  %v398_v16 = vpack.c.bf16 %v1136_v14, %v1132_v12  ;;  %v854_v12 = vand.u32 127, %v308_v47 }
 0x11f   : > { %v399_v17 = vpack.c.bf16 %v1138_v15, %v1134_v13 }
 0x120   : > { %vm855_vm1 = vcmp.ge.s32.totalorder %v854_v12, 8 }
 0x121   : > { %646 = vmatprep.mubr.bf16.mxu1 %v399_v17 }
 0x122   : > { %647 = vmatmul.mubr.bf16.gmra.mrb[4].mxu1 %v398_v16 }
 0x1ed   : > { %v638_v31 = vpop.f32.mrb[0].mxu1 }
 0x1ee   : > { %v639_v32 = vadd.f32 %v638_v31, %v437_v29  ;;  %v640_v33 = vpop.f32.mrb[1].mxu1 }
 0x1ef   : > { %v641_v34 = vadd.f32 %v640_v33, %v441_v30  ;;  %v642_v35 = vpop.f32.mrb[2].mxu1 }
 0x1f0   : > { %1139 = vtanh.f32 %v639_v32  ;;  %v643_v36 = vadd.f32 %v642_v35, %v437_v29  ;;  %v644_v37 = vpop.f32.mrb[3].mxu1 }
 0x1f1   : > { %1141 = vtanh.f32 %v641_v34  ;;  %v645_v38 = vadd.f32 %v644_v37, %v441_v30 }
 0x1f2   : > { %1143 = vtanh.f32 %v643_v36 }
 0x1f3   : > { %1145 = vtanh.f32 %v645_v38 }
 0x1f5   : > { %v648_v39 = vpop.f32.mrb[4].mxu1 }
 0x1f6   : > { %v649_v40 = vadd.f32 %v648_v39, %v437_v29  ;;  %v650_v41 = vpop.f32.mrb[5].mxu1 }
 0x1f7   : > { %v651_v42 = vadd.f32 %v650_v41, %v441_v30  ;;  %v652_v43 = vpop.f32.mrb[6].mxu1 }
 0x1f8   : > { %1147 = vtanh.f32 %v649_v40  ;;  %v653_v44 = vadd.f32 %v652_v43, %v437_v29  ;;  %v654_v45 = vpop.f32.mrb[7].mxu1 }
 0x1f9   : > { %1149 = vtanh.f32 %v651_v42  ;;  %v655_v46 = vadd.f32 %v654_v45, %v441_v30 }
 0x1fa   : > { %v1140_v48 = vpop.eup %1139  ;;  %1151 = vtanh.f32 %v653_v44 }
 0x1fb   : > { %v1142_v49 = vpop.eup %1141  ;;  %1153 = vtanh.f32 %v655_v46 }
 0x1fc   : > { %v1144_v50 = vpop.eup %1143 }
 0x1fd   : > { %v1146_v51 = vpop.eup %1145  ;;  %v665_v52 = vpack.c.bf16 %v1144_v50, %v1140_v48 }
 0x1fe   : > { %v666_v53 = vpack.c.bf16 %v1146_v51, %v1142_v49 }
 0x200   : > { %836 = vmatprep.mubr.bf16.mxu0 %v666_v53 }
 0x201   : > { %837 = vmatmul.mubr.bf16.vlgmr.msra.gmra.mrb[8].mxu0 %v665_v52 }
 0x202   : > { %v1148_v54 = vpop.eup %1147 }
 0x203   : > { %v1150_v55 = vpop.eup %1149 }
 0x204   : > { %v1152_v56 = vpop.eup %1151 }
 0x205   : > { %v1154_v57 = vpop.eup %1153  ;;  %v667_v58 = vpack.c.bf16 %v1152_v56, %v1148_v54 }
 0x206   : > { %v668_v59 = vpack.c.bf16 %v1154_v57, %v1150_v55 }
 0x208   : > { %844 = vmatprep.mubr.bf16.mxu0 %v668_v59 }
 0x209   : > { %845 = vmatmul.mubr.bf16.gmra.mrb[12].mxu0 %v667_v58 }
 0x2d4   : > { %v1022_v60 = vpop.f32.mrb[8].mxu0 }
 0x2d5   : > { %v1023_v62 = vpop.f32.mrb[9].mxu0 }
 0x2d6   : > { %v1024_v63 = vadd.f32 %v1023_v62, %v1022_v60  ;;  %v1025_v0 = vpop.f32.mrb[10].mxu0 }
 0x2d7   : > { %v1026_v1 = vpop.f32.mrb[11].mxu0 }
 0x2d8   : > { %v839_v2 = vadd.f32 %v1024_v63, %v987_v61  ;;  %v1027_v3 = vadd.f32 %v1026_v1, %v1025_v0 }
 0x2da   : > { %v856_v4 = vmul.f32 1.442695, %v839_v2  ;;  %v842_v5 = vadd.f32 %v1027_v3, %v987_v61 }
 0x2dc   : > { %1155 = vpow2.f32 %v856_v4  ;;  %v858_v6 = vmul.f32 1.442695, %v842_v5  ;;  %v1028_v7 = vpop.f32.mrb[12].mxu0 }
 0x2dd   : > { %v1029_v8 = vpop.f32.mrb[13].mxu0 }
 0x2de   : > { %1157 = vpow2.f32 %v858_v6  ;;  %v1030_v9 = vadd.f32 %v1029_v8, %v1028_v7  ;;  %v1031_v10 = vpop.f32.mrb[14].mxu0 }
 0x2df   : > { %v1032_v11 = vpop.f32.mrb[15].mxu0 }
 0x2e0   : > { %v847_v13 = vadd.f32 %v1030_v9, %v987_v61  ;;  %v1033_v14 = vadd.f32 %v1032_v11, %v1031_v10 }
 0x2e2   : > { %v860_v15 = vmul.f32 1.442695, %v847_v13  ;;  %v850_v16 = vadd.f32 %v1033_v14, %v987_v61 }
 0x2e4   : > { %1159 = vpow2.f32 %v860_v15  ;;  %v862_v17 = vmul.f32 1.442695, %v850_v16 }
 0x2e6   : > { %v1156_v18 = vpop.eup %1155  ;;  %1161 = vpow2.f32 %v862_v17 }
 0x2e7   : > { %v864_v19 = vsel %vm855_vm1, %v1156_v18, %v839_v2 }
 0x2e8   : > { %v1158_v20 = vpop.eup %1157  ;;  %868 = vst.msk [vmem:[%s295_s25] sm:$0xff] %vm328_vm0, %v864_v19 }
 0x2e9   : > { %v865_v21 = vsel %vm855_vm1, %v1158_v20, %v842_v5 }
 0x2ea   : > { %869 = vst.msk [vmem:[%s295_s25 + $0x8] sm:$0xff] %vm328_vm0, %v865_v21 }
 0x2ee   : > { %v1160_v47 = vpop.eup %1159 }
 0x2ef   : > { %v866_v22 = vsel %vm855_vm1, %v1160_v47, %v847_v13 }
 0x2f0   : > { %v1162_v23 = vpop.eup %1161  ;;  %870 = vst.msk [vmem:[%s295_s25 + $0x10] sm:$0xff] %vm328_vm0, %v866_v22 }
 0x2f1   : > { %v867_v24 = vsel %vm855_vm1, %v1162_v23, %v850_v16 }
 0x2f2   : > { %871 = vst.msk [vmem:[%s295_s25 + $0x18] sm:$0xff] %vm328_vm0, %v867_v24 }
 0x2f3 PF: > { %s18_s24 = sadd.s32 1, %s1201_s24  }
 0x2f4   : > { %p15_p3 = scmp.ge.s32.totalorder %s18_s24, 4  }
 0x2f6   :  { %17 = sbr.rel (!%p15_p3) target bundleno = 1 (0x1), region = 83 }
 0x2fd   :  { %894 = vsyncpa [#allocation3], 1 }
 0x2fe   :  { %896 = vsyncpa [#allocation3 + $0x1], 1 }

</bundles_post_ra>
